<compile_context>
chip_gen: v6e
topology: v6e:2x2x1
jax: 0.10.0
libtpu: 0.0.40
codegen_flags: <defaults>
</compile_context>

<pallas_src>
import functools

import jax
import jax.numpy as jnp
from jax.experimental import pallas as pl
from jax.experimental.pallas import tpu as pltpu

_LANE_CHUNK = 128                       # contraction chunk = MXU / lane width
_TARGET_OUT_BLOCK_BYTES = 6 << 20       # ~6 MiB output blocks amortize the
                                        # ~0.35 us/grid-step overhead
_VMEM_LIMIT_BYTES = 48 * 1024 * 1024    # safe on v5e/v6e (128 MiB) and v7x (64 MiB)
_MAX_RESIDENT_E_BYTES = 8 << 20         # budget for the resident one-hot matrix


# ----------------------------------------------------------------------------
# In-kernel expansion
# ----------------------------------------------------------------------------
def _expand_tile(xv, e):
    """Exactly expand a (tr, K) tile to (tr, K_out) through the one-hot bf16
    matrix `e`, with correct replication of Inf/NaN source pixels.

    A plain one-hot matmul computes sum_k 0*x_k + 1*x_src and 0*Inf / 0*NaN
    = NaN would contaminate the whole contraction row, so non-finite pixels
    are zeroed before the matmul and re-inserted afterwards from a small
    integer code expanded through the same one-hot matrix.
    """
    x32 = xv.astype(jnp.float32)
    finite = jnp.isfinite(x32)

    if xv.dtype == jnp.bfloat16:
        xs = jnp.where(finite, xv, jnp.zeros_like(xv))
        y = jnp.dot(xs, e, preferred_element_type=jnp.float32)
    else:
        # Exact 3-term bf16 split of the sanitized f32 values: `e` is exact in
        # bf16 and every bf16*bf16 product is exact in f32, so three DEFAULT
        # passes reproduce the f32 input bit-exactly (finite values) at half
        # the MXU cost of a single f32xf32 Precision.HIGHEST matmul.
        xs = jnp.where(finite, x32, 0.0)
        h1 = xs.astype(jnp.bfloat16)
        r1 = xs - h1.astype(jnp.float32)
        h2 = r1.astype(jnp.bfloat16)
        h3 = (r1 - h2.astype(jnp.float32)).astype(jnp.bfloat16)
        y = (jnp.dot(h1, e, preferred_element_type=jnp.float32)
             + jnp.dot(h2, e, preferred_element_type=jnp.float32)
             + jnp.dot(h3, e, preferred_element_type=jnp.float32))

    # Non-finite code: 0 = finite, 1 = +Inf, 2 = -Inf, 3 = NaN (all exact in
    # bf16); expanded exactly through the one-hot matrix and decoded on the VPU.
    code = jnp.where(finite, 0.0,
                     jnp.where(jnp.isnan(x32), 3.0,
                               jnp.where(x32 > 0.0, 1.0, 2.0)))
    c = jnp.dot(code.astype(jnp.bfloat16), e, preferred_element_type=jnp.float32)
    y = jnp.where(c == 1.0, jnp.inf, y)
    y = jnp.where(c == 2.0, -jnp.inf, y)
    y = jnp.where(c == 3.0, jnp.nan, y)
    return y


def _full_kernel(x_ref, e_ref, o_ref):
    """Small/odd-width path: one lane-dense expansion per row tile."""
    o_ref[...] = _expand_tile(x_ref[...], e_ref[...]).astype(o_ref.dtype)


def _chunk_kernel(x_ref, e_ref, o_ref, y_ref):
    """Chunked path: expand a 128-wide W chunk once (a == 0) into VMEM scratch
    and re-store it for every vertical replica a > 0 (s_h de-duplication)."""
    @pl.when(pl.program_id(2) == 0)
    def _():
        y_ref[...] = _expand_tile(x_ref[...], e_ref[...])

    o_ref[...] = y_ref[...].astype(o_ref.dtype)


# ----------------------------------------------------------------------------
# Host-side helpers
# ----------------------------------------------------------------------------
def _onehot_expansion(w, s_h, s_w, g, dtype):
    """One-hot (g*w, g*s_h*w*s_w) expansion matrix.

    Packed output column  q = h_local*(s_h*w*s_w) + a*(w*s_w) + w_src*s_w + b
    and E[p, q] = 1 iff p == h_local*w + w_src, so `x_packed @ E` replicates
    every source pixel s_h*s_w times in exact NCHW row-major output order.
    """
    cols = jnp.arange(g * s_h * w * s_w, dtype=jnp.int32)
    col_h = cols // (s_h * w * s_w)
    col_w = (cols % (w * s_w)) // s_w
    src = col_h * w + col_w
    rows = jnp.arange(g * w, dtype=jnp.int32)
    return (rows[:, None] == src[None, :]).astype(dtype)


def _round_up(x, m):
    return -(-x // m) * m


def _pick_row_tile(rows, out_row_bytes):
    """Row tile: multiple of 8 (sublanes), output block ~_TARGET_OUT_BLOCK_BYTES,
    and at least two row tiles so the 'parallel' grid axis can split across
    v7x's two TensorCores (and the pipeline has something to overlap)."""
    if rows <= 8:
        return rows                       # block dim == full dim is always legal
    cap = max(8, (_TARGET_OUT_BLOCK_BYTES // max(out_row_bytes, 1)) // 8 * 8)
    half = _round_up(_round_up(rows, 2) // 2, 8)
    return max(8, min(cap, half))


def _pick_row_group(h, w, s_h, s_w):
    """Fold `g` consecutive input rows into the lane dimension so tiny feature
    maps still get >= 256-wide (unmasked, lane-dense) output stores."""
    w_out_row = s_h * w * s_w
    g = 1
    for cand in range(1, h + 1):
        if h % cand:
            continue
        if (cand * w) * (cand * w_out_row) * 2 > (4 << 20):   # bf16 one-hot cap
            break
        g = cand
        if cand * w_out_row >= 256:
            break
    return g


# ----------------------------------------------------------------------------
# Wrapper
# ----------------------------------------------------------------------------
def nearest_upsample_nchw(x, s_h, s_w):
    """out[n, c, h*s_h + a, w*s_w + b] = x[n, c, h, w]  (integer factors)."""
    n, c, h, w = x.shape
    if s_h == 1 and s_w == 1:
        return x
    out_dtype = x.dtype
    w_out_row = s_h * w * s_w            # packed output width per input row

    if w % _LANE_CHUNK == 0:
        # ---- chunked path (realistic image widths) -------------------------
        rows = n * c * h
        n_wc = w // _LANE_CHUNK
        blk_w_out = _LANE_CHUNK * s_w
        e = _onehot_expansion(_LANE_CHUNK, 1, s_w, 1, jnp.bfloat16)
        x2 = x.reshape(rows, w)          # free view of contiguous NCHW
        tr = _pick_row_tile(rows, blk_w_out * 4)
        grid = (pl.cdiv(rows, tr), n_wc, s_h)

        out2 = pl.pallas_call(
            _chunk_kernel,
            out_shape=jax.ShapeDtypeStruct((rows, w_out_row), out_dtype),
            grid=grid,
            in_specs=[
                pl.BlockSpec((tr, _LANE_CHUNK), lambda i, wc, a: (i, wc)),
                pl.BlockSpec(e.shape, lambda i, wc, a: (0, 0)),   # resident
            ],
            out_specs=pl.BlockSpec(
                (tr, blk_w_out), lambda i, wc, a: (i, a * n_wc + wc)),
            scratch_shapes=[pltpu.VMEM((tr, blk_w_out), jnp.float32)],
            compiler_params=pltpu.CompilerParams(
                dimension_semantics=("parallel", "arbitrary", "arbitrary"),
                vmem_limit_bytes=_VMEM_LIMIT_BYTES),
        )(x2, e)
        # Row r packs the s_h replicated output rows side by side -> free reshape.
        return out2.reshape(n, c, h * s_h, w * s_w)

    if w * w_out_row * 2 > _MAX_RESIDENT_E_BYTES:
        # TODO(synk): very wide maps whose W is not a multiple of 128 would need
        # a ragged column grid; fall back to XLA repeat (pure data movement).
        return jnp.repeat(jnp.repeat(x, s_h, axis=2), s_w, axis=3)

    # ---- small / odd-width path ---------------------------------------------
    # Fold `g` consecutive input rows into the lane dimension (lane-dense
    # stores even for tiny maps) and fold s_h into the one-hot matrix: the
    # extra MXU work is irrelevant here because the contraction K = g*W is small.
    g = _pick_row_group(h, w, s_h, s_w)
    rows_g = n * c * (h // g)
    e = _onehot_expansion(w, s_h, s_w, g, jnp.bfloat16)
    x2 = x.reshape(rows_g, g * w)        # free view of contiguous NCHW
    tr = _pick_row_tile(rows_g, g * w_out_row * 4)
    grid = (pl.cdiv(rows_g, tr),)

    out2 = pl.pallas_call(
        _full_kernel,
        out_shape=jax.ShapeDtypeStruct((rows_g, g * w_out_row), out_dtype),
        grid=grid,
        in_specs=[
            pl.BlockSpec((tr, g * w), lambda i: (i, 0)),
            pl.BlockSpec(e.shape, lambda i: (0, 0)),              # resident
        ],
        out_specs=pl.BlockSpec((tr, g * w_out_row), lambda i: (i, 0)),
        compiler_params=pltpu.CompilerParams(
            dimension_semantics=("parallel",),
            vmem_limit_bytes=_VMEM_LIMIT_BYTES),
    )(x2, e)
    # The packed row layout follows NCHW row-major order exactly -> free reshape.
    return out2.reshape(n, c, h * s_h, w * s_w)


def interpolate_forward(x, scale_factor, mode="nearest"):
    """Forward pass of the `interpolate` module (4-D NCHW input)."""
    if mode != "nearest":
        # TODO(synk): only mode='nearest' (the module default) is implemented.
        raise NotImplementedError(f"mode={mode!r} not supported")
    if isinstance(scale_factor, (tuple, list)):
        s_h, s_w = scale_factor
    else:
        s_h = s_w = scale_factor
    if int(s_h) != s_h or int(s_w) != s_w or s_h < 1 or s_w < 1:
        # TODO(synk): non-integer scale factors are not implemented.
        raise NotImplementedError("only positive integer scale factors supported")
    if x.ndim != 4:
        # TODO(synk): only 4-D NCHW inputs are implemented (no 3-D / 5-D).
        raise NotImplementedError("only 4-D NCHW inputs supported")
    s_h, s_w = int(s_h), int(s_w)
    if x.dtype.name not in ("float32", "bfloat16", "float16"):
        # TODO(synk): integer/bool dtypes deserve a dedicated VPU copy kernel
        # (v7x's MXU has no integer support); route through XLA repeat for now.
        return jnp.repeat(jnp.repeat(x, s_h, axis=2), s_w, axis=3)
    return nearest_upsample_nchw(x, s_h, s_w)


def reference_forward(x, scale_factor):
    """Pure-JAX reference (matches F.interpolate 'nearest', integer factors)."""
    if isinstance(scale_factor, (tuple, list)):
        s_h, s_w = (int(v) for v in scale_factor)
    else:
        s_h = s_w = int(scale_factor)
    return jnp.repeat(jnp.repeat(x, s_h, axis=2), s_w, axis=3)


if __name__ == "__main__":
    key = jax.random.PRNGKey(0)
    k1, k2 = jax.random.split(key)

    # Module default: mode='nearest', scale_factor=2.
    x = jax.random.normal(k1, (2, 4, 16, 16), jnp.float32)
    fwd2 = jax.jit(functools.partial(interpolate_forward, scale_factor=2))
    out2 = jax.block_until_ready(fwd2(x))
    ref2 = reference_forward(x, 2)
    assert out2.shape == (2, 4, 32, 32), out2.shape
    assert bool(jnp.allclose(out2, ref2, rtol=0.0, atol=1e-6)), "scale=2 mismatch"

    # Anisotropic scale_factor=(2, 3).
    fwd23 = jax.jit(functools.partial(interpolate_forward, scale_factor=(2, 3)))
    out23 = jax.block_until_ready(fwd23(x))
    ref23 = reference_forward(x, (2, 3))
    assert out23.shape == (2, 4, 32, 48), out23.shape
    assert bool(jnp.allclose(out23, ref23, rtol=0.0, atol=1e-6)), "scale=(2,3) mismatch"

    # Wider map: exercises the chunked (W % 128 == 0) path, the s_h
    # de-duplication scratch, and exact Inf/NaN replication.
    xw = jax.random.normal(k2, (1, 2, 8, 256), jnp.float32)
    xw = xw.at[0, 0, 0, 0].set(jnp.inf).at[0, 1, 3, 7].set(jnp.nan)
    fwdw = jax.jit(functools.partial(interpolate_forward, scale_factor=2))
    outw = jax.block_until_ready(fwdw(xw))
    refw = reference_forward(xw, 2)
    assert outw.shape == (1, 2, 16, 512), outw.shape
    assert bool(jnp.allclose(outw, refw, rtol=0.0, atol=1e-6, equal_nan=True)), \
        "chunked path mismatch"

    print("KERNEL_OK")
</pallas_src>

<mosaic_0001>
module attributes {stable_mosaic.version = 11 : i64} {
  func.func @_full_kernel(%arg0: i32, %arg1: memref<16x64xf32, #tpu.memory_space<vmem>>, %arg2: memref<64x256xbf16, #tpu.memory_space<vmem>>, %arg3: memref<16x256xf32, #tpu.memory_space<vmem>>) attributes {dimension_semantics = [#tpu.dimension_semantics<parallel>], iteration_bounds = array<i64: 2>, scalar_prefetch = 0 : i64, scratch_operands = 0 : i64, tpu.core_type = #tpu.core_type<tc>, window_params = [{transform_indices = @transform_0, window_bounds = array<i64: 16, 64>}, {pipeline_mode = #tpu.pipeline_mode<synchronous>, transform_indices = @transform_1, window_bounds = array<i64: 64, 256>}, {transform_indices = @transform_2, window_bounds = array<i64: 16, 256>}]} {
    %c0 = arith.constant 0 : index
    %c0_0 = arith.constant 0 : index
    %0 = vector.load %arg1[%c0, %c0_0] : memref<16x64xf32, #tpu.memory_space<vmem>>, vector<16x64xf32>
    %c0_1 = arith.constant 0 : index
    %c0_2 = arith.constant 0 : index
    %1 = vector.load %arg2[%c0_1, %c0_2] : memref<64x256xbf16, #tpu.memory_space<vmem>>, vector<64x256xbf16>
    %2 = tpu.weird %0 : vector<16x64xf32> -> vector<16x64xi1>
    %cst = arith.constant dense<true> : vector<16x64xi1>
    %3 = arith.xori %2, %cst : vector<16x64xi1>
    %cst_3 = arith.constant 0.000000e+00 : f32
    %4 = vector.broadcast %cst_3 : f32 to vector<16x64xf32>
    %5 = arith.select %3, %0, %4 : vector<16x64xi1>, vector<16x64xf32>
    %6 = arith.truncf %5 : vector<16x64xf32> to vector<16x64xbf16>
    %7 = arith.extf %6 : vector<16x64xbf16> to vector<16x64xf32>
    %8 = arith.subf %5, %7 : vector<16x64xf32>
    %9 = arith.truncf %8 : vector<16x64xf32> to vector<16x64xbf16>
    %10 = arith.extf %9 : vector<16x64xbf16> to vector<16x64xf32>
    %11 = arith.subf %8, %10 : vector<16x64xf32>
    %12 = arith.truncf %11 : vector<16x64xf32> to vector<16x64xbf16>
    %cst_4 = arith.constant dense<0.000000e+00> : vector<16x256xf32>
    %13 = tpu.matmul %6, %1, %cst_4 {dimension_numbers = #tpu.dot_dimension_numbers<[1], [0], [0], [1], [0, 0, 1, 1], [], []>} : vector<16x64xbf16>, vector<64x256xbf16>, vector<16x256xf32> -> vector<16x256xf32>
    %cst_5 = arith.constant dense<0.000000e+00> : vector<16x256xf32>
    %14 = tpu.matmul %9, %1, %cst_5 {dimension_numbers = #tpu.dot_dimension_numbers<[1], [0], [0], [1], [0, 0, 1, 1], [], []>} : vector<16x64xbf16>, vector<64x256xbf16>, vector<16x256xf32> -> vector<16x256xf32>
    %15 = arith.addf %13, %14 : vector<16x256xf32>
    %cst_6 = arith.constant dense<0.000000e+00> : vector<16x256xf32>
    %16 = tpu.matmul %12, %1, %cst_6 {dimension_numbers = #tpu.dot_dimension_numbers<[1], [0], [0], [1], [0, 0, 1, 1], [], []>} : vector<16x64xbf16>, vector<64x256xbf16>, vector<16x256xf32> -> vector<16x256xf32>
    %17 = arith.addf %15, %16 : vector<16x256xf32>
    %18 = arith.cmpf one, %0, %0 : vector<16x64xf32>
    %cst_7 = arith.constant 0.000000e+00 : f32
    %19 = vector.broadcast %cst_7 : f32 to vector<16x64xf32>
    %20 = arith.cmpf ogt, %0, %19 : vector<16x64xf32>
    %cst_8 = arith.constant 1.000000e+00 : f32
    %cst_9 = arith.constant 2.000000e+00 : f32
    %21 = vector.broadcast %cst_8 : f32 to vector<16x64xf32>
    %22 = vector.broadcast %cst_9 : f32 to vector<16x64xf32>
    %23 = arith.select %20, %21, %22 : vector<16x64xi1>, vector<16x64xf32>
    %cst_10 = arith.constant 3.000000e+00 : f32
    %24 = vector.broadcast %cst_10 : f32 to vector<16x64xf32>
    %25 = arith.select %18, %24, %23 : vector<16x64xi1>, vector<16x64xf32>
    %cst_11 = arith.constant 0.000000e+00 : f32
    %26 = vector.broadcast %cst_11 : f32 to vector<16x64xf32>
    %27 = arith.select %3, %26, %25 : vector<16x64xi1>, vector<16x64xf32>
    %28 = arith.truncf %27 : vector<16x64xf32> to vector<16x64xbf16>
    %cst_12 = arith.constant dense<0.000000e+00> : vector<16x256xf32>
    %29 = tpu.matmul %28, %1, %cst_12 {dimension_numbers = #tpu.dot_dimension_numbers<[1], [0], [0], [1], [0, 0, 1, 1], [], []>} : vector<16x64xbf16>, vector<64x256xbf16>, vector<16x256xf32> -> vector<16x256xf32>
    %cst_13 = arith.constant 1.000000e+00 : f32
    %30 = vector.broadcast %cst_13 : f32 to vector<16x256xf32>
    %31 = arith.cmpf oeq, %29, %30 : vector<16x256xf32>
    %cst_14 = arith.constant 0x7F800000 : f32
    %32 = vector.broadcast %cst_14 : f32 to vector<16x256xf32>
    %33 = arith.select %31, %32, %17 : vector<16x256xi1>, vector<16x256xf32>
    %cst_15 = arith.constant 2.000000e+00 : f32
    %34 = vector.broadcast %cst_15 : f32 to vector<16x256xf32>
    %35 = arith.cmpf oeq, %29, %34 : vector<16x256xf32>
    %cst_16 = arith.constant 0xFF800000 : f32
    %36 = vector.broadcast %cst_16 : f32 to vector<16x256xf32>
    %37 = arith.select %35, %36, %33 : vector<16x256xi1>, vector<16x256xf32>
    %cst_17 = arith.constant 3.000000e+00 : f32
    %38 = vector.broadcast %cst_17 : f32 to vector<16x256xf32>
    %39 = arith.cmpf oeq, %29, %38 : vector<16x256xf32>
    %cst_18 = arith.constant 0x7FC00000 : f32
    %40 = vector.broadcast %cst_18 : f32 to vector<16x256xf32>
    %41 = arith.select %39, %40, %37 : vector<16x256xi1>, vector<16x256xf32>
    %c0_19 = arith.constant 0 : index
    %c0_20 = arith.constant 0 : index
    %42 = vector.load %arg3[%c0_19, %c0_20] : memref<16x256xf32, #tpu.memory_space<vmem>>, vector<16x256xf32>
    tpu.vector_store %arg3[%c0_19, %c0_20], %41 {strides = array<i32>} : memref<16x256xf32, #tpu.memory_space<vmem>>, vector<16x256xf32>,
    return
  }
  func.func @transform_0(%arg0: i32) -> (i32, i32) {
    %c0_i32 = arith.constant 0 : i32
    %c0_i32_0 = arith.constant 0 : i32
    return %arg0, %c0_i32 : i32, i32
  }
  func.func @transform_1(%arg0: i32) -> (i32, i32) {
    %c0_i32 = arith.constant 0 : i32
    %c0_i32_0 = arith.constant 0 : i32
    %c0_i32_1 = arith.constant 0 : i32
    return %c0_i32, %c0_i32_0 : i32, i32
  }
  func.func @transform_2(%arg0: i32) -> (i32, i32) {
    %c0_i32 = arith.constant 0 : i32
    %c0_i32_0 = arith.constant 0 : i32
    return %arg0, %c0_i32 : i32, i32
  }
}

</mosaic_0001>

<bundles_post_ra>
// kernel: interpolate_forward.1
= control target key start
LH: loop header
LB: loop body
LE: loop exit
PB: predicated region body
PF: predicated region fallthrough
CT: control target
= control target key end

     0   :  { %s577_s9 = smov 0   ;;  %s648_s0 = inlined_call_operand.vmem [shape: f32[32,64], index: 0, kind: input, shape index: {}]   ;;  %s649_s1 = inlined_call_operand.vmem [shape: bf16[64,256], index: 1, kind: input, shape index: {}]   ;;  %s650_s2 = inlined_call_operand.vmem [shape: f32[32,256], index: 2, kind: output, shape index: {}]  }
   0x1 LB: > { %s503_s10 = sadd.s32 4294967295, %s557_s9   ;;  %p507_p0 = scmp.ge.s32.totalorder %s557_s9, 1  ;;  %s557_s9 = sphi %s577_s9, %s12_s9  }
   0x2   : > { %p113_p1 = scmp.lt.s32.totalorder %s557_s9, 3 }
   0x4   : > { %p114_p2 = pnand %p507_p0, %p113_p1 }
   0x5   : > { %s508_s13 = sshll.u32 (!%p114_p2), %s503_s10, 1 }
   0x6   : > { %117 = sbr.rel (%p114_p2) target bundleno = 251 (0xfb), region = 28  ;;  %p137_p3 = scmp.lt.s32.totalorder (!%p114_p2), %s508_s13, 3 }
   0xb   : > { %v539_v0 = vld [vmem:[%s649_s1 + $0x34] ss:$8 sps:$4 sm:$0xff]   ;;  %v541_v1 = vld [vmem:[%s649_s1 + $0x30] ss:$8 sps:$4 sm:$0xff]   ;;  %v559_v2 = vmov 0   ;;  %s656_s13 = smov (!%p137_p3, %s508_s13), 3 }
   0xc   : > { %253 = vmatprep.mubr.bf16.mxu0 %v559_v2  ;;  %299 = vmatprep.mubr.bf16.mxu1 %v559_v2  ;;  %v542_v3 = vld [vmem:[%s649_s1 + $0x24] ss:$8 sps:$4 sm:$0xff]   ;;  %v544_v4 = vld [vmem:[%s649_s1 + $0x20] ss:$8 sps:$4 sm:$0xff]   ;;  %v545_v5 = vld [vmem:[%s649_s1 + $0x14] ss:$8 sps:$4 sm:$0xff]  }
   0xd   : > { %229 = vmatprep.subr.bf16.mxu0 %v539_v0  ;;  %275 = vmatprep.subr.bf16.mxu1 %v539_v0  ;;  %s509_s22 = sshll.u32 %s656_s13, 3  ;;  %v547_v6 = vld [vmem:[%s649_s1 + $0x10] ss:$8 sps:$4 sm:$0xff]   ;;  %v548_v9 = vld [vmem:[%s649_s1 + $0x4] ss:$8 sps:$4 sm:$0xff]   ;;  %vm560_vm2 = vmmov 1  }
   0xe   : > { %230 = vmatpush1.bf16.msra.mxu0 %v541_v1  ;;  %276 = vmatpush1.bf16.msra.mxu1 %v541_v1  ;;  %s140_s25 = scalar_lea.vmem %s648_s0, %s509_s22  ;;  %v550_v13 = vld [vmem:[%s649_s1] ss:$8 sps:$4 sm:$0xff]   ;;  %vm217_vm5 = vcmask 523264   ;;  %v561_v21 = vmov 2.0   ;;  %s527_s4 = sshll.u32 %s656_s13, 4 }
   0xf   : > { %231 = vmatprep.subr.bf16.mxu0 %v542_v3  ;;  %277 = vmatprep.subr.bf16.mxu1 %v542_v3  ;;  %v150_v7 = vld [vmem:[%s140_s25] sm:$0xff]  ;;  %v151_v8 = vld [vmem:[%s140_s25 + $0x8] sm:$0xff]  ;;  %s639_s7 = scalar_lea.vmem %s650_s2, %s527_s4 }
  0x10   : > { %vm160_vm0 = vweird.f32 %v150_v7  ;;  %vm161_vm1 = vweird.f32 %v151_v8  ;;  %vm362_vm6 = vcmp.gt.f32.partialorder %v150_v7, 0.0  ;;  %vm363_vm7 = vcmp.gt.f32.partialorder %v151_v8, 0.0 }
  0x11   : > { %vm612_vm3 = vmxor %vm160_vm0, %vm560_vm2  ;;  %vm360_vm8 = vcmp.ne.f32.partialorder %v150_v7, %v150_v7  ;;  %vm361_vm9 = vcmp.ne.f32.partialorder %v151_v8, %v151_v8  ;;  %v364_v22 = vsel %vm362_vm6, 1.0, %v561_v21  ;;  %v365_v23 = vsel %vm363_vm7, 1.0, %v561_v21 }
  0x12   : > { %232 = vmatpush1.bf16.msra.mxu0 %v544_v4  ;;  %278 = vmatpush1.bf16.msra.mxu1 %v544_v4  ;;  %vm616_vm4 = vmxor %vm161_vm1, %vm560_vm2  ;;  %v164_v12 = vsel %vm612_vm3, %v150_v7, 0.0  ;;  %v366_v26 = vsel %vm360_vm8, 3.0, %v364_v22  ;;  %v367_v27 = vsel %vm361_vm9, 3.0, %v365_v23 }
  0x13   : > { %233 = vmatprep.subr.bf16.mxu0 %v545_v5  ;;  %279 = vmatprep.subr.bf16.mxu1 %v545_v5  ;;  %v165_v14 = vsel %vm616_vm4, %v151_v8, 0.0  ;;  %v368_v28 = vsel %vm612_vm3, 0.0, %v366_v26  ;;  %v369_v29 = vsel %vm616_vm4, 0.0, %v367_v27 }
  0x14   : > { %v166_v15 = vpack.c.bf16 %v165_v14, %v164_v12  ;;  %v370_v32 = vpack.c.bf16 %v369_v29, %v368_v28 }
  0x16   : > { %234 = vmatpush1.bf16.msra.mxu0 %v547_v6  ;;  %280 = vmatpush1.bf16.msra.mxu1 %v547_v6  ;;  %v167_v16 = vunpack.c.l.bf16 %v166_v15  ;;  %v168_v17 = vunpack.c.h.bf16 %v166_v15 }
  0x17   : > { %235 = vmatprep.subr.bf16.mxu0 %v548_v9  ;;  %281 = vmatprep.subr.bf16.mxu1 %v548_v9 }
  0x18   : > { %v169_v18 = vsub.f32 %v164_v12, %v167_v16  ;;  %v170_v19 = vsub.f32 %v165_v14, %v168_v17 }
  0x1a   : > { %236 = vmatpush1.bf16.msra.mxu0 %v550_v13  ;;  %282 = vmatpush1.bf16.msra.mxu1 %v550_v13  ;;  %v171_v20 = vpack.c.bf16 %v170_v19, %v169_v18 }
  0x1b   : > { %321 = vmatprep.subr.bf16.mxu0 %v539_v0  ;;  %382 = vmatprep.subr.bf16.mxu1 %v539_v0 }
  0x1c   : > { %v172_v24 = vunpack.c.l.bf16 %v171_v20  ;;  %v173_v25 = vunpack.c.h.bf16 %v171_v20 }
  0x1d   : > { %522 = vmatmul.mubr.msk.bf16.vlgmr.msra.gmra.mxu1 %vm217_vm5, %v166_v15  ;;  %521 = vmatmul.mubr.msk.bf16.vlgmr.msra.gmra.mxu0 %vm217_vm5, %v171_v20 }
  0x1e   : > { %383 = vmatpush1.bf16.msra.mxu1 %v541_v1  ;;  %406 = vmatprep.mubr.bf16.mxu1 %v559_v2  ;;  %v174_v30 = vsub.f32 %v169_v18, %v172_v24  ;;  %v175_v31 = vsub.f32 %v170_v19, %v173_v25 }
  0x1f   : > { %384 = vmatprep.subr.bf16.mxu1 %v542_v3  ;;  %322 = vmatpush1.bf16.msra.mxu0 %v541_v1 }
  0x20   : > { %345 = vmatprep.mubr.bf16.mxu0 %v559_v2  ;;  %323 = vmatprep.subr.bf16.mxu0 %v542_v3  ;;  %v176_v33 = vpack.c.bf16 %v175_v31, %v174_v30 }
  0x22   : > { %385 = vmatpush1.bf16.msra.mxu1 %v544_v4 }
  0x23   : > { %386 = vmatprep.subr.bf16.mxu1 %v545_v5  ;;  %324 = vmatpush1.bf16.msra.mxu0 %v544_v4 }
  0x24   : > { %325 = vmatprep.subr.bf16.mxu0 %v545_v5 }
  0x26   : > { %387 = vmatpush1.bf16.msra.mxu1 %v547_v6 }
  0x27   : > { %388 = vmatprep.subr.bf16.mxu1 %v548_v9  ;;  %326 = vmatpush1.bf16.msra.mxu0 %v547_v6 }
  0x28   : > { %327 = vmatprep.subr.bf16.mxu0 %v548_v9 }
  0x2a   : > { %389 = vmatpush1.bf16.msra.mxu1 %v550_v13 }
  0x2b   : > { %328 = vmatpush1.bf16.msra.mxu0 %v550_v13 }
  0x2d   : > { %524 = vmatmul.mubr.msk.bf16.vlgmr.msra.gmra.mxu1 %vm217_vm5, %v370_v32 }
  0x2e   : > { %523 = vmatmul.mubr.msk.bf16.vlgmr.msra.gmra.mxu0 %vm217_vm5, %v176_v33 }
  0xdd   : > { %v301_v34 = vpop.f32.mrf.mxu1  ;;  %v255_v35 = vpop.f32.mrf.mxu0 }
  0xde   : > { %v302_v43 = vadd.f32 %v301_v34, %v255_v35 }
  0xdf   : > { %v303_v36 = vpop.f32.mrf.mxu1  ;;  %v257_v37 = vpop.f32.mrf.mxu0 }
  0xe0   : > { %v304_v46 = vadd.f32 %v303_v36, %v257_v37 }
  0xe1   : > { %v305_v38 = vpop.f32.mrf.mxu1  ;;  %v259_v39 = vpop.f32.mrf.mxu0 }
  0xe2   : > { %v306_v50 = vadd.f32 %v305_v38, %v259_v39 }
  0xe3   : > { %v307_v40 = vpop.f32.mrf.mxu1  ;;  %v261_v41 = vpop.f32.mrf.mxu0 }
  0xe4   : > { %v308_v53 = vadd.f32 %v307_v40, %v261_v41 }
  0xed   : > { %v408_v42 = vpop.f32.mrf.mxu1 }
  0xee   : > { %v347_v44 = vpop.f32.mrf.mxu0  ;;  %vm417_vm10 = vcmp.eq.f32.partialorder %v408_v42, 1.0  ;;  %vm425_vm11 = vcmp.eq.f32.partialorder %v408_v42, 2.0  ;;  %vm433_vm13 = vcmp.eq.f32.partialorder %v408_v42, 3.0 }
  0xef   : > { %v410_v45 = vpop.f32.mrf.mxu1  ;;  %v356_v47 = vadd.f32 %v347_v44, %v302_v43 }
  0xf0   : > { %v349_v48 = vpop.f32.mrf.mxu0  ;;  %vm418_vm12 = vcmp.eq.f32.partialorder %v410_v45, 1.0  ;;  %vm426_vm15 = vcmp.eq.f32.partialorder %v410_v45, 2.0  ;;  %vm434_vm0 = vcmp.eq.f32.partialorder %v410_v45, 3.0 }
  0xf1   : > { %v412_v49 = vpop.f32.mrf.mxu1  ;;  %v421_v51 = vsel %vm417_vm10, inf, %v356_v47  ;;  %v357_v52 = vadd.f32 %v349_v48, %v304_v46 }
  0xf2   : > { %v429_v54 = vsel %vm425_vm11, -inf, %v421_v51  ;;  %v351_v55 = vpop.f32.mrf.mxu0  ;;  %vm419_vm14 = vcmp.eq.f32.partialorder %v412_v49, 1.0  ;;  %vm427_vm2 = vcmp.eq.f32.partialorder %v412_v49, 2.0  ;;  %vm435_vm3 = vcmp.eq.f32.partialorder %v412_v49, 3.0 }
  0xf3   : > { %v414_v56 = vpop.f32.mrf.mxu1  ;;  %v437_v57 = vsel %vm433_vm13, nan, %v429_v54  ;;  %v422_v58 = vsel %vm418_vm12, inf, %v357_v52  ;;  %v358_v59 = vadd.f32 %v351_v55, %v306_v50 }
  0xf4   : > { %441 = vst [vmem:[%s639_s7] sm:$0xff] %v437_v57  ;;  %v430_v60 = vsel %vm426_vm15, -inf, %v422_v58  ;;  %v353_v61 = vpop.f32.mrf.mxu0  ;;  %vm420_vm1 = vcmp.eq.f32.partialorder %v414_v56, 1.0  ;;  %vm428_vm4 = vcmp.eq.f32.partialorder %v414_v56, 2.0  ;;  %vm436_vm5 = vcmp.eq.f32.partialorder %v414_v56, 3.0 }
  0xf5   : > { %v438_v62 = vsel %vm434_vm0, nan, %v430_v60  ;;  %v423_v63 = vsel %vm419_vm14, inf, %v358_v59  ;;  %v359_v0 = vadd.f32 %v353_v61, %v308_v53 }
  0xf6   : > { %442 = vst [vmem:[%s639_s7 + $0x8] sm:$0xff] %v438_v62  ;;  %v431_v1 = vsel %vm427_vm2, -inf, %v423_v63 }
  0xf7   : > { %v439_v2 = vsel %vm435_vm3, nan, %v431_v1  ;;  %v424_v3 = vsel %vm420_vm1, inf, %v359_v0 }
  0xf8   : > { %443 = vst [vmem:[%s639_s7 + $0x10] sm:$0xff] %v439_v2  ;;  %v432_v4 = vsel %vm428_vm4, -inf, %v424_v3 }
  0xf9   : > { %v440_v5 = vsel %vm436_vm5, nan, %v432_v4 }
  0xfa   : > { %444 = vst [vmem:[%s639_s7 + $0x18] sm:$0xff] %v440_v5 }
  0xfb PF: > { %s12_s9 = sadd.s32 1, %s557_s9  }
  0xfc   : > { %p9_p4 = scmp.ge.s32.totalorder %s12_s9, 4  }
  0xfe   :  { %11 = sbr.rel (!%p9_p4) target bundleno = 1 (0x1), region = 58 }

</bundles_post_ra>
